<compile_context>
chip_gen: v5e
topology: v5e:2x2
jax: 0.10.0
libtpu: 0.0.40
codegen_flags: <defaults>
</compile_context>

<pallas_src>
import jax
import jax.numpy as jnp
import numpy as np
from jax.experimental import pallas as pl
from jax.experimental.pallas import tpu as pltpu


# ---------------------------------------------------------------------------
# Kernel: two lane-dense matmuls per grid step.
#   f_ref  : (T*C, Nt)         time-major flattened features, N on lanes
#   a_ref  : (2*Tp*C, T*C)     fused diff+conv effective weight (both branches stacked)
#   ba_ref : (2*Tp*C, 1)       conv biases tiled over time, per branch
#   wf_ref : (out_dim, 2*Tp*C) fused FC weight (PyTorch c-major-then-t order honored)
#   bf_ref : (out_dim, 1)
#   o_ref  : (out_dim, Nt)
# ---------------------------------------------------------------------------
def temporal_kernel(f_ref, a_ref, ba_ref, wf_ref, bf_ref, o_ref):
    # h = ReLU(A_eff @ f + b_conv)      -> (2*Tp*C, Nt), f32 accumulation on the MXU
    h = jnp.dot(a_ref[...], f_ref[...], preferred_element_type=jnp.float32)
    h = jnp.maximum(h + ba_ref[...], 0.0)
    # out = F_eff @ h + b_fc            -> (out_dim, Nt)
    o = jnp.dot(wf_ref[...], h.astype(wf_ref.dtype),
                preferred_element_type=jnp.float32) + bf_ref[...]
    o_ref[...] = o.astype(o_ref.dtype)


# ---------------------------------------------------------------------------
# Host-side (numpy) weight folding — run ONCE per parameter set, not per call.
# ---------------------------------------------------------------------------
def _diff_matrix(T, C, order):
    """Finite-difference operator on a time-major flattened (t*C + c) vector.

    Returns D of shape ((T-order)*C, T*C) such that (D @ f_flat) is the order-th
    temporal difference, still flattened as t*C + c.
    """
    D = np.eye(T * C, dtype=np.float32)
    for o in range(order):
        Tc = T - o
        M = np.zeros(((Tc - 1) * C, Tc * C), dtype=np.float32)
        for t in range(Tc - 1):
            for c in range(C):
                M[t * C + c, t * C + c] = -1.0
                M[t * C + c, (t + 1) * C + c] = 1.0
        D = M @ D
    return D


def _banded_conv_matrix(W, Tp):
    """Conv1d (stride 1, 'same' zero padding, odd K) as a block-banded matrix.

    W: (C_out, C_in, K).  Acting on a length-Tp signal flattened time-major as
    s*C_in + c_in, returns A of shape (Tp*C_out, Tp*C_in) with
    (A @ x_flat)[t*C_out + c_out] == conv1d(x)[c_out, t].
    """
    W = np.asarray(W, np.float32)
    C_out, C_in, K = W.shape
    pad = (K - 1) // 2  # matches PyTorch padding=1 / padding=2 for K=3 / K=5
    A = np.zeros((Tp, C_out, Tp, C_in), np.float32)
    for t in range(Tp):
        for k in range(K):
            s = t + k - pad
            if 0 <= s < Tp:
                A[t, :, s, :] = W[:, :, k]
    return A.reshape(Tp * C_out, Tp * C_in)


def fold_temporal_params(params, time_window, diff_order=1):
    """Fold diff + both convs + FC-reordering into two small effective matrices (numpy).

    Returns host constants; call this once per parameter set and reuse across forwards.
    """
    assert diff_order in (1, 2, 3)
    W1, b1, W2, b2, Wfc, bfc = (np.asarray(p, np.float32) for p in params)
    C = W1.shape[0]
    T = time_window
    Tp = T - diff_order
    out_dim = Wfc.shape[0]
    assert Wfc.shape[1] == 2 * C * Tp, \
        "fc in_dim only consistent with diff_order=1 (as in the PyTorch module)"

    D = _diff_matrix(T, C, diff_order)                        # (Tp*C, T*C)
    A1 = _banded_conv_matrix(W1, Tp)                          # (Tp*C, Tp*C)
    A2 = _banded_conv_matrix(W2, Tp)                          # (Tp*C, Tp*C)
    A_eff = np.concatenate([A1, A2], axis=0) @ D              # (2*Tp*C, T*C)
    bA = np.concatenate([np.tile(b1, Tp),
                         np.tile(b2, Tp)]).reshape(2 * Tp * C, 1).astype(np.float32)

    # PyTorch flatten order of each conv output is c-major-then-t: index c*Tp + t.
    Wfc_r = Wfc.reshape(out_dim, 2, C, Tp)                    # [o, branch, c, t]
    F1 = np.transpose(Wfc_r[:, 0], (0, 2, 1)).reshape(out_dim, Tp * C)  # [o, t*C + c]
    F2 = np.transpose(Wfc_r[:, 1], (0, 2, 1)).reshape(out_dim, Tp * C)
    F_eff = np.concatenate([F1, F2], axis=1)                  # (out_dim, 2*Tp*C)
    bF = bfc.reshape(out_dim, 1).astype(np.float32)

    return dict(A_eff=A_eff, bA=bA, F_eff=F_eff, bF=bF,
                T=T, C=C, Tp=Tp, out_dim=out_dim, diff_order=diff_order)


# ---------------------------------------------------------------------------
# Tile-size selection (generation-aware heuristics from the VMEM budget).
# ---------------------------------------------------------------------------
def _round_up(x, m):
    return -(-x // m) * m


def _pick_row_tile(N, in_rows, hid_rows, out_rows, in_itemsize,
                   vmem_budget_bytes, max_tile):
    # double-buffered f tile + double-buffered out tile + f32 hidden temps (x2 slack)
    bytes_per_lane = (2 * in_rows * in_itemsize
                      + 2 * out_rows * 4
                      + 2 * hid_rows * 4)
    tile = min(max_tile, max(128, vmem_budget_bytes // max(bytes_per_lane, 1)))
    # never larger than the 128-padded problem
    tile = min(tile, _round_up(N, 128))
    # keep >= 2 grid steps when N is large so the 'parallel' axis can shard
    # across both TensorCores on 2-TC (v7x-class) chips
    if N >= 4 * 128:
        tile = min(tile, _round_up(_round_up(N, 128) // 2, 128))
    return max(128, (tile // 128) * 128)


# ---------------------------------------------------------------------------
# Forward wrapper.
# ---------------------------------------------------------------------------
def temporal_forward(features, folded, *, row_tile=None,
                     compute_dtype=jnp.float32,
                     vmem_budget_bytes=12 << 20, max_row_tile=32768,
                     lane_major_output=False):
    """features: (B, T, I, C) float32 — same semantics as TemporalModel.forward.

    `folded` is the result of fold_temporal_params(params, ...) (host constants).
    compute_dtype=jnp.bfloat16 halves HBM traffic for the f slab / weights (v5e/v6e lever);
    keep f32 when a 1e-4 match against the reference is required.
    """
    T, C, Tp, out_dim = folded["T"], folded["C"], folded["Tp"], folded["out_dim"]
    B, Tf, I, Cf = features.shape
    assert Tf == T and Cf == C, "features shape inconsistent with folded params"
    N = B * I

    in_itemsize = np.dtype(compute_dtype).itemsize
    if row_tile is None:
        row_tile = _pick_row_tile(N, T * C, 2 * Tp * C, out_dim, in_itemsize,
                                  vmem_budget_bytes, max_row_tile)
    row_tile = max(128, (min(row_tile, max_row_tile) // 128) * 128)

    # ---- layout glue: (B, T, I, C) -> (T*C, N), N = b*I + i on the lane axis.
    # allow_input_fusion below lets XLA pull this transpose/pad into the pallas_call
    # input pipeline instead of a separate full-HBM pass.
    f = jnp.transpose(features, (1, 3, 0, 2)).reshape(T * C, N).astype(compute_dtype)
    Np = _round_up(N, row_tile)
    if Np != N:
        f = jnp.pad(f, ((0, 0), (0, Np - N)))   # zero lanes: computed then sliced off

    A_eff = jnp.asarray(folded["A_eff"], compute_dtype)
    F_eff = jnp.asarray(folded["F_eff"], compute_dtype)
    bA = jnp.asarray(folded["bA"], jnp.float32)
    bF = jnp.asarray(folded["bF"], jnp.float32)

    # advisory cost hint for the XLA scheduler
    flops = 2 * Np * (2 * Tp * C) * (T * C) + 2 * Np * out_dim * (2 * Tp * C)
    bytes_accessed = (in_itemsize * (T * C * Np + A_eff.size + F_eff.size)
                      + 4 * (out_dim * Np + bA.size + bF.size))
    cost = pl.CostEstimate(flops=flops, transcendentals=0,
                           bytes_accessed=bytes_accessed)

    out = pl.pallas_call(
        temporal_kernel,
        out_shape=jax.ShapeDtypeStruct((out_dim, Np), jnp.float32),
        grid=(Np // row_tile,),
        in_specs=[
            pl.BlockSpec((T * C, row_tile), lambda i: (0, i)),          # features tile
            pl.BlockSpec((2 * Tp * C, T * C), lambda i: (0, 0)),        # A_eff (resident)
            pl.BlockSpec((2 * Tp * C, 1), lambda i: (0, 0)),            # conv biases
            pl.BlockSpec((out_dim, 2 * Tp * C), lambda i: (0, 0)),      # F_eff (resident)
            pl.BlockSpec((out_dim, 1), lambda i: (0, 0)),               # fc bias
        ],
        out_specs=pl.BlockSpec((out_dim, row_tile), lambda i: (0, i)),
        compiler_params=pltpu.CompilerParams(
            dimension_semantics=("parallel",),
            vmem_limit_bytes=32 << 20,                 # headroom for MiB-scale tiles on v5e
            allow_input_fusion=[True, False, False, False, False],
        ),
        cost_estimate=cost,
    )(f, A_eff, bA, F_eff, bF)

    out = out[:, :N]
    if lane_major_output:
        return out                                   # (out_dim, N): skip the extra HBM pass
    return out.T.reshape(B, I, out_dim)              # nn.Module return layout


# ---------------------------------------------------------------------------
# Pure-JAX reference mirroring the PyTorch forward exactly.
# ---------------------------------------------------------------------------
def reference_forward(features, params, *, diff_order=1):
    W1, b1, W2, b2, Wfc, bfc = params
    B, T, I, C = features.shape
    d = features
    for _ in range(diff_order):
        d = d[:, 1:] - d[:, :-1]
    x = jnp.transpose(d, (0, 2, 3, 1)).reshape(B * I, C, -1)     # (N, C, Tp)

    def conv1d(x, w, b, pad):
        y = jax.lax.conv_general_dilated(
            x, w, window_strides=(1,), padding=[(pad, pad)],
            dimension_numbers=('NCH', 'OIH', 'NCH'))
        return y + b[None, :, None]

    h1 = jax.nn.relu(conv1d(x, W1, b1, (W1.shape[2] - 1) // 2))
    h2 = jax.nn.relu(conv1d(x, W2, b2, (W2.shape[2] - 1) // 2))
    N = B * I
    combined = jnp.concatenate([h1.reshape(N, -1), h2.reshape(N, -1)], axis=-1)
    result = combined @ Wfc.T + bfc
    return result.reshape(B, I, -1)


if __name__ == "__main__":
    # small shapes implied by the forward: (batch, time_window, instance, in_dim)
    B, T, I, C, out_dim = 2, 5, 16, 4, 8
    diff_order = 1

    key = jax.random.PRNGKey(0)
    ks = jax.random.split(key, 8)
    features = jax.random.normal(ks[0], (B, T, I, C), jnp.float32)

    # deterministic synthetic parameters (shapes from nn.Module.__init__)
    W1 = jax.random.normal(ks[1], (C, C, 3), jnp.float32) * 0.3      # conv1.weight
    b1 = jax.random.normal(ks[2], (C,), jnp.float32) * 0.1           # conv1.bias
    W2 = jax.random.normal(ks[3], (C, C, 5), jnp.float32) * 0.3      # conv2.weight
    b2 = jax.random.normal(ks[4], (C,), jnp.float32) * 0.1           # conv2.bias
    Wfc = jax.random.normal(ks[5], (out_dim, C * 2 * (T - 1)), jnp.float32) * 0.2  # fc.weight
    bfc = jax.random.normal(ks[6], (out_dim,), jnp.float32) * 0.1    # fc.bias
    params = (W1, b1, W2, b2, Wfc, bfc)

    # host-side folding: once per parameter set (hoisted out of the per-call path)
    folded = fold_temporal_params(params, time_window=T, diff_order=diff_order)

    # 1) small problem (single 128-lane tile)
    out = jax.block_until_ready(temporal_forward(features, folded))
    assert out.shape == (B, I, out_dim)
    ref = reference_forward(features, params, diff_order=diff_order)
    np.testing.assert_allclose(np.asarray(out), np.asarray(ref), rtol=1e-4, atol=1e-4)

    # 2) larger ragged N -> multi-step 'parallel' grid + zero-padded boundary lanes
    B2, I2 = 3, 200
    features2 = jax.random.normal(ks[7], (B2, T, I2, C), jnp.float32)
    out2 = jax.block_until_ready(temporal_forward(features2, folded))
    ref2 = reference_forward(features2, params, diff_order=diff_order)
    np.testing.assert_allclose(np.asarray(out2), np.asarray(ref2), rtol=1e-4, atol=1e-4)

    print("KERNEL_OK")
</pallas_src>

<mosaic_0001>
module attributes {stable_mosaic.version = 11 : i64} {
  func.func @temporal_kernel(%arg0: i32, %arg1: memref<20x128xf32, #tpu.memory_space<vmem>>, %arg2: memref<32x20xf32, #tpu.memory_space<vmem>>, %arg3: memref<32x1xf32, #tpu.memory_space<vmem>>, %arg4: memref<8x32xf32, #tpu.memory_space<vmem>>, %arg5: memref<8x1xf32, #tpu.memory_space<vmem>>, %arg6: memref<8x128xf32, #tpu.memory_space<vmem>>) attributes {dimension_semantics = [#tpu.dimension_semantics<parallel>], iteration_bounds = array<i64: 1>, scalar_prefetch = 0 : i64, scratch_operands = 0 : i64, tpu.core_type = #tpu.core_type<tc>, window_params = [{transform_indices = @transform_0, window_bounds = array<i64: 20, 128>}, {pipeline_mode = #tpu.pipeline_mode<synchronous>, transform_indices = @transform_1, window_bounds = array<i64: 32, 20>}, {pipeline_mode = #tpu.pipeline_mode<synchronous>, transform_indices = @transform_2, window_bounds = array<i64: 32, 1>}, {pipeline_mode = #tpu.pipeline_mode<synchronous>, transform_indices = @transform_3, window_bounds = array<i64: 8, 32>}, {pipeline_mode = #tpu.pipeline_mode<synchronous>, transform_indices = @transform_4, window_bounds = array<i64: 8, 1>}, {transform_indices = @transform_5, window_bounds = array<i64: 8, 128>}]} {
    %c0 = arith.constant 0 : index
    %c0_0 = arith.constant 0 : index
    %0 = vector.load %arg2[%c0, %c0_0] : memref<32x20xf32, #tpu.memory_space<vmem>>, vector<32x20xf32>
    %c0_1 = arith.constant 0 : index
    %c0_2 = arith.constant 0 : index
    %1 = vector.load %arg1[%c0_1, %c0_2] : memref<20x128xf32, #tpu.memory_space<vmem>>, vector<20x128xf32>
    %cst = arith.constant dense<0.000000e+00> : vector<32x128xf32>
    %2 = tpu.matmul %0, %1, %cst {dimension_numbers = #tpu.dot_dimension_numbers<[1], [0], [0], [1], [0, 0, 1, 1], [], []>} : vector<32x20xf32>, vector<20x128xf32>, vector<32x128xf32> -> vector<32x128xf32>
    %c0_3 = arith.constant 0 : index
    %c0_4 = arith.constant 0 : index
    %3 = vector.load %arg3[%c0_3, %c0_4] : memref<32x1xf32, #tpu.memory_space<vmem>>, vector<32x1xf32>
    %4 = vector.broadcast %3 : vector<32x1xf32> to vector<32x128xf32>
    %5 = arith.addf %2, %4 : vector<32x128xf32>
    %cst_5 = arith.constant 0.000000e+00 : f32
    %6 = vector.broadcast %cst_5 : f32 to vector<32x128xf32>
    %7 = arith.maximumf %5, %6 : vector<32x128xf32>
    %c0_6 = arith.constant 0 : index
    %c0_7 = arith.constant 0 : index
    %8 = vector.load %arg4[%c0_6, %c0_7] : memref<8x32xf32, #tpu.memory_space<vmem>>, vector<8x32xf32>
    %cst_8 = arith.constant dense<0.000000e+00> : vector<8x128xf32>
    %9 = tpu.matmul %8, %7, %cst_8 {dimension_numbers = #tpu.dot_dimension_numbers<[1], [0], [0], [1], [0, 0, 1, 1], [], []>} : vector<8x32xf32>, vector<32x128xf32>, vector<8x128xf32> -> vector<8x128xf32>
    %c0_9 = arith.constant 0 : index
    %c0_10 = arith.constant 0 : index
    %10 = vector.load %arg5[%c0_9, %c0_10] : memref<8x1xf32, #tpu.memory_space<vmem>>, vector<8x1xf32>
    %11 = vector.broadcast %10 : vector<8x1xf32> to vector<8x128xf32>
    %12 = arith.addf %9, %11 : vector<8x128xf32>
    %c0_11 = arith.constant 0 : index
    %c0_12 = arith.constant 0 : index
    %13 = vector.load %arg6[%c0_11, %c0_12] : memref<8x128xf32, #tpu.memory_space<vmem>>, vector<8x128xf32>
    tpu.vector_store %arg6[%c0_11, %c0_12], %12 {strides = array<i32>} : memref<8x128xf32, #tpu.memory_space<vmem>>, vector<8x128xf32>,
    return
  }
  func.func @transform_0(%arg0: i32) -> (i32, i32) {
    %c0_i32 = arith.constant 0 : i32
    %c0_i32_0 = arith.constant 0 : i32
    return %c0_i32, %arg0 : i32, i32
  }
  func.func @transform_1(%arg0: i32) -> (i32, i32) {
    %c0_i32 = arith.constant 0 : i32
    %c0_i32_0 = arith.constant 0 : i32
    %c0_i32_1 = arith.constant 0 : i32
    return %c0_i32, %c0_i32_0 : i32, i32
  }
  func.func @transform_2(%arg0: i32) -> (i32, i32) {
    %c0_i32 = arith.constant 0 : i32
    %c0_i32_0 = arith.constant 0 : i32
    %c0_i32_1 = arith.constant 0 : i32
    return %c0_i32, %c0_i32_0 : i32, i32
  }
  func.func @transform_3(%arg0: i32) -> (i32, i32) {
    %c0_i32 = arith.constant 0 : i32
    %c0_i32_0 = arith.constant 0 : i32
    %c0_i32_1 = arith.constant 0 : i32
    return %c0_i32, %c0_i32_0 : i32, i32
  }
  func.func @transform_4(%arg0: i32) -> (i32, i32) {
    %c0_i32 = arith.constant 0 : i32
    %c0_i32_0 = arith.constant 0 : i32
    %c0_i32_1 = arith.constant 0 : i32
    return %c0_i32, %c0_i32_0 : i32, i32
  }
  func.func @transform_5(%arg0: i32) -> (i32, i32) {
    %c0_i32 = arith.constant 0 : i32
    %c0_i32_0 = arith.constant 0 : i32
    return %c0_i32, %arg0 : i32, i32
  }
}

</mosaic_0001>

<bundles_post_ra>
// kernel: tpu_custom_call.1
= control target key start
LH: loop header
LB: loop body
LE: loop exit
PB: predicated region body
PF: predicated region fallthrough
CT: control target
= control target key end

     0   :  { %vm65_vm0 = vcmask 1043456   ;;  %v193_v3 = vmov 0   ;;  %vm52_vm1 = vcmask 162816   ;;  %s271_s0 = inlined_call_operand.vmem [shape: f32[20,128], index: 0, kind: input, shape index: {}]   ;;  %s272_s1 = inlined_call_operand.vmem [shape: f32[32,20], index: 1, kind: input, shape index: {}]   ;;  %s273_s2 = inlined_call_operand.vmem [shape: f32[32,1], index: 2, kind: input, shape index: {}]   ;;  %s274_s3 = inlined_call_operand.vmem [shape: f32[8,32], index: 3, kind: input, shape index: {}]   ;;  %s275_s4 = inlined_call_operand.vmem [shape: f32[8,1], index: 4, kind: input, shape index: {}]   ;;  %s276_s5 = inlined_call_operand.hbm [shape: f32[8,128], index: 5, kind: output, shape index: {}]  }
   0x1   :  { %v27_v0 = vld [vmem:[%s271_s0 + $0x10] sm:$0xf]  ;;  %v26_v1 = vld [vmem:[%s271_s0 + $0x8] sm:$0xff]  ;;  %v25_v2 = vld [vmem:[%s271_s0] sm:$0xff]  ;;  %164 = vset.pattern.permute.xlu0 %v193_v3 }
   0x2   :  { %156 = vmatpush.msk.msra.mxu2 %vm65_vm0, %v27_v0  ;;  %157 = vmatpush.msk.msra.mxu3 %vm65_vm0, %v27_v0  ;;  %v31_v4 = vld [vmem:[%s273_s2 + $0x18] sm:$0xff]  ;;  %v22_v5 = vld [vmem:[%s272_s1 + $0x8] sm:$0xff] }
   0x3   :  { %150 = vmatpush.msk.msra.mxu0 %vm65_vm0, %v27_v0  ;;  %v24_v6 = vld [vmem:[%s272_s1 + $0x18] sm:$0xff] }
   0x4   :  { %158 = vmatpush.msra.mxu2 %v26_v1  ;;  %159 = vmatpush.msra.mxu3 %v26_v1 }
   0x5   :  { %10 = vsyncpa [#allocation3], 0  ;;  %83 = vmatpush.msra.mxu0 %v26_v1  ;;  %49 = vperm.xlu0 %164, %v31_v4   ;;  %v21_v7 = vld [vmem:[%s272_s1] sm:$0xff]  ;;  %v29_v8 = vld [vmem:[%s273_s2 + $0x8] sm:$0xff]  ;;  %vm109_vm2 = vcmask 261120   ;;  %s141_s19 = sshll.u32 %s276_s5, 4  ;;  %s142_s19 = int_to_ptr.hbm [resolvable:$true] %s141_s19 }
   0x6   :  { %160 = vmatpush.msra.mxu2 %v25_v2  ;;  %161 = vmatpush.msra.mxu3 %v25_v2  ;;  %v30_v9 = vld [vmem:[%s273_s2 + $0x10] sm:$0xff]  ;;  %v28_v11 = vld [vmem:[%s273_s2] sm:$0xff] }
   0x7   :  { %152 = vmatmul.msk.f32.vlgmr.msra.gmra.mxu2 %vm52_vm1, %v22_v5  ;;  %154 = vmatmul.msk.f32.vlgmr.msra.gmra.mxu3 %vm52_vm1, %v24_v6  ;;  %v23_v10 = vld [vmem:[%s272_s1 + $0x10] sm:$0xff]  ;;  %v103_v12 = vld [vmem:[%s275_s4] sm:$0xff]  ;;  %s194_s4 = smov [#allocation2]  }
   0x8   :  { %84 = vmatpush.msra.mxu0 %v25_v2  ;;  %165 = vset.pattern.permute.xlu1 %v193_v3  ;;  %v102_v29 = vld [vmem:[%s274_s3] sm:$0xff]  ;;  %s139_s16 = sshll.u32 %s194_s4, 4  ;;  %s140_s16 = int_to_ptr.vmem [resolvable:$true] %s139_s16 }
   0x9   :  { %151 = vmatmul.msk.f32.vlgmr.msra.gmra.mxu0 %vm52_vm1, %v21_v7  ;;  %39 = vperm.xlu1 %165, %v29_v8  }
   0xa   :  { %166 = vset.pattern.permute.xlu2 %v193_v3 }
   0xb   :  { %106 = vperm.xlu2 %166, %v103_v12  }
   0xd   :  { %44 = vperm.xlu0 %164, %v30_v9  }
   0xf   :  { %153 = vmatmul.msk.f32.gmra.mxu2 %vm52_vm1, %v23_v10 }
  0x11   :  { %34 = vperm.xlu1 %165, %v28_v11  }
  0x65   :  { %v107_v30 = vpop.permute.xlu2 %106 }
  0x77   :  { %v50_v13 = vpop.permute.xlu0 %49 }
  0x7b   :  { %v40_v14 = vpop.permute.xlu1 %39 }
  0x7f   :  { %v45_v19 = vpop.permute.xlu0 %44 }
  0x83   :  { %v35_v20 = vpop.permute.xlu1 %34 }
  0x86   :  { %v86_v21 = vpop.f32.mrf.mxu0 }
  0x87   :  { %v87_v25 = vadd.f32 %v86_v21, %v35_v20 }
  0x89   :  { %v98_v28 = vmax.f32 %v87_v25, 0.0 }
  0x8a   :  { %v89_v15 = vpop.f32.mrf.mxu2  ;;  %v95_v16 = vpop.f32.mrf.mxu3 }
  0x8b   :  { %v96_v17 = vadd.f32 %v95_v16, %v50_v13  ;;  %v90_v23 = vadd.f32 %v89_v15, %v40_v14 }
  0x8d   :  { %v101_v18 = vmax.f32 %v96_v17, 0.0  ;;  %v99_v27 = vmax.f32 %v90_v23, 0.0 }
  0x8f   :  { %125 = vmatpush.msra.mxu1 %v101_v18 }
  0x92   :  { %v92_v22 = vpop.f32.mrf.mxu2 }
  0x93   :  { %v93_v24 = vadd.f32 %v92_v22, %v45_v19 }
  0x95   :  { %v100_v26 = vmax.f32 %v93_v24, 0.0 }
  0x97   :  { %126 = vmatpush.msra.mxu1 %v100_v26 }
  0x99   :  { %127 = vmatpush.msra.mxu1 %v99_v27 }
  0x9b   :  { %128 = vmatpush.msra.mxu1 %v98_v28 }
  0x9c   :  { %155 = vmatmul.msk.f32.vlgmr.msra.gmra.mxu1 %vm109_vm2, %v102_v29 }
 0x119   :  { %v130_v31 = vpop.f32.mrf.mxu1 }
 0x11a   :  { %v131_v32 = vadd.f32 %v130_v31, %v107_v30 }
 0x11c   :  { %133 = vst [vmem:[#allocation2] sm:$0xff] %v131_v32 }
 0x11d   :  { %144 = dma.vmem_to_hbm [thread:$0]  %s140_s16, 128, %s142_s19, [#allocation3]  }
 0x11e   :  { %191 = dma.done.wait [#allocation3], 128  }
 0x11f   :  { %192 = vsyncadd [#allocation3], 4294967168 }
 0x120   :  { %149 = vsyncpa [#allocation3], 1 }

</bundles_post_ra>
